<compile_context>
chip_gen: v7x
topology: tpu7x:2x2x1
jax: 0.10.0
libtpu: 0.0.40
codegen_flags: <defaults>
</compile_context>

<pallas_src>
import functools

import jax
import jax.numpy as jnp
import numpy as np
from jax.experimental import pallas as pl
from jax.experimental.pallas import tpu as pltpu

HID = 16


def _dropout(h, p):
    # Inverted dropout: keep iff raw uint32 bits >= p * 2^32  (keep prob = 1 - p).
    bits = pltpu.bitcast(pltpu.prng_random_bits(h.shape), jnp.uint32)
    threshold = jnp.uint32(min(int(p * float(1 << 32)), (1 << 32) - 1))
    return jnp.where(bits >= threshold, h * (1.0 / (1.0 - p)), 0.0)


def mlp4drop_kernel(seed_ref, x_ref,
                    w1_ref, b1_ref, w2_ref, b2_ref,
                    w3_ref, b3_ref, w4_ref, b4_ref,
                    o_ref, *, p, training):
    # Transposed layout: x_ref [F, TB], w* [out, in] (PyTorch nn.Linear layout),
    # b* [out, 1], o_ref [n_classes, TB]. Batch is on the lane axis.
    if training:
        # Per-tile seed so dropout masks differ across batch tiles.
        pltpu.prng_seed(seed_ref[0] + pl.program_id(0))

    h = x_ref[...]

    h = jnp.dot(w1_ref[...], h, preferred_element_type=jnp.float32) + b1_ref[...]
    h = jnp.maximum(h, 0.0)
    if training:
        h = _dropout(h, p)

    h = jnp.dot(w2_ref[...], h, preferred_element_type=jnp.float32) + b2_ref[...]
    h = jnp.maximum(h, 0.0)
    if training:
        h = _dropout(h, p)

    h = jnp.dot(w3_ref[...], h, preferred_element_type=jnp.float32) + b3_ref[...]
    h = jnp.maximum(h, 0.0)
    if training:
        h = _dropout(h, p)

    out = jnp.dot(w4_ref[...], h, preferred_element_type=jnp.float32) + b4_ref[...]
    o_ref[...] = out.astype(o_ref.dtype)


def mlp4drop_forward(x, params, *, p=0.2, training=False, seed=0, batch_tile=1024):
    """Fused 4-layer MLP forward. x: [B, n_input] float32 -> [B, n_classes]."""
    w1, b1, w2, b2, w3, b3, w4, b4 = params
    B, F = x.shape
    n_classes = w4.shape[0]

    # Batch tile on the lane axis: either the whole (small) batch, or a multiple
    # of 128 with zero-padding of the tail tile.
    if B <= batch_tile:
        tb, b_pad = B, B
    else:
        tb = batch_tile                       # multiple of 128
        b_pad = pl.cdiv(B, tb) * tb

    x_t = x.T                                 # [F, B]  (batch -> lanes)
    if b_pad != B:
        x_t = jnp.pad(x_t, ((0, 0), (0, b_pad - B)))

    seed_arr = jnp.array([seed], dtype=jnp.int32)
    kernel = functools.partial(mlp4drop_kernel, p=p, training=training)

    resident = lambda i, seed: (0, 0)         # weights/biases stay VMEM-resident

    flops = 2 * B * (F * HID + HID * HID * 2 + HID * n_classes)
    bytes_accessed = 4 * (B * (F + n_classes)
                          + F * HID + 2 * HID * HID + HID * n_classes
                          + 3 * HID + n_classes)

    out_t = pl.pallas_call(
        kernel,
        out_shape=jax.ShapeDtypeStruct((n_classes, b_pad), jnp.float32),
        grid_spec=pltpu.PrefetchScalarGridSpec(
            num_scalar_prefetch=1,
            grid=(b_pad // tb,),
            in_specs=[
                pl.BlockSpec((F, tb), lambda i, seed: (0, i)),   # x_T tile
                pl.BlockSpec((HID, F), resident),                # w1
                pl.BlockSpec((HID, 1), resident),                # b1
                pl.BlockSpec((HID, HID), resident),              # w2
                pl.BlockSpec((HID, 1), resident),                # b2
                pl.BlockSpec((HID, HID), resident),              # w3
                pl.BlockSpec((HID, 1), resident),                # b3
                pl.BlockSpec((n_classes, HID), resident),        # w4
                pl.BlockSpec((n_classes, 1), resident),          # b4
            ],
            out_specs=pl.BlockSpec((n_classes, tb), lambda i, seed: (0, i)),
        ),
        compiler_params=pltpu.CompilerParams(
            dimension_semantics=("parallel",)),
        cost_estimate=pl.CostEstimate(
            flops=flops, transcendentals=0, bytes_accessed=bytes_accessed),
    )(seed_arr, x_t, w1, b1, w2, b2, w3, b3, w4, b4)

    return out_t[:, :B].T                     # back to [B, n_classes]


def init_params(key, n_input, n_classes):
    """Deterministic init mimicking nn.Linear's U(-1/sqrt(fan_in), +1/sqrt(fan_in)).

    Weights are stored in PyTorch layout [out_features, in_features];
    biases as [out_features, 1] (column vectors for the transposed kernel)."""
    dims = [(n_input, HID), (HID, HID), (HID, HID), (HID, n_classes)]
    params = []
    for din, dout in dims:
        key, kw, kb = jax.random.split(key, 3)
        bound = 1.0 / np.sqrt(din)
        w = jax.random.uniform(kw, (dout, din), jnp.float32, -bound, bound)
        b = jax.random.uniform(kb, (dout, 1), jnp.float32, -bound, bound)
        params += [w, b]
    return params


def reference_forward(x, params):
    """Plain-JAX eval-mode reference (dropout == identity)."""
    w1, b1, w2, b2, w3, b3, w4, b4 = params
    h = jnp.maximum(x @ w1.T + b1[:, 0], 0.0)
    h = jnp.maximum(h @ w2.T + b2[:, 0], 0.0)
    h = jnp.maximum(h @ w3.T + b3[:, 0], 0.0)
    return h @ w4.T + b4[:, 0]


if __name__ == "__main__":
    n_input, n_classes = 32, 2
    key = jax.random.PRNGKey(0)
    key, kx1, kx2 = jax.random.split(key, 3)
    params = init_params(key, n_input, n_classes)

    # Case 1: small batch, single grid step (block == full array).
    x_small = jax.random.normal(kx1, (8, n_input), dtype=jnp.float32)
    out_small = jax.block_until_ready(mlp4drop_forward(x_small, params, p=0.2))
    ref_small = reference_forward(x_small, params)
    np.testing.assert_allclose(np.asarray(out_small), np.asarray(ref_small),
                               rtol=1e-4, atol=1e-4)

    # Case 2: batch-tiled + padded path (B=300, tile=128 -> grid of 3, padded to 384).
    x_big = jax.random.normal(kx2, (300, n_input), dtype=jnp.float32)
    out_big = jax.block_until_ready(
        mlp4drop_forward(x_big, params, p=0.2, batch_tile=128))
    ref_big = reference_forward(x_big, params)
    np.testing.assert_allclose(np.asarray(out_big), np.asarray(ref_big),
                               rtol=1e-4, atol=1e-4)

    print("KERNEL_OK")
</pallas_src>

<mosaic_0001>
module attributes {stable_mosaic.version = 11 : i64} {
  func.func @mlp4drop_kernel(%arg0: i32, %arg1: memref<1xi32, #tpu.memory_space<smem>>, %arg2: memref<32x8xf32, #tpu.memory_space<vmem>>, %arg3: memref<16x32xf32, #tpu.memory_space<vmem>>, %arg4: memref<16x1xf32, #tpu.memory_space<vmem>>, %arg5: memref<16x16xf32, #tpu.memory_space<vmem>>, %arg6: memref<16x1xf32, #tpu.memory_space<vmem>>, %arg7: memref<16x16xf32, #tpu.memory_space<vmem>>, %arg8: memref<16x1xf32, #tpu.memory_space<vmem>>, %arg9: memref<2x16xf32, #tpu.memory_space<vmem>>, %arg10: memref<2x1xf32, #tpu.memory_space<vmem>>, %arg11: memref<2x8xf32, #tpu.memory_space<vmem>>) attributes {dimension_semantics = [#tpu.dimension_semantics<parallel>], iteration_bounds = array<i64: 1>, scalar_prefetch = 1 : i64, scratch_operands = 0 : i64, tpu.core_type = #tpu.core_type<tc>, window_params = [{transform_indices = @transform_0, window_bounds = array<i64: 32, 8>}, {pipeline_mode = #tpu.pipeline_mode<synchronous>, transform_indices = @transform_1, window_bounds = array<i64: 16, 32>}, {pipeline_mode = #tpu.pipeline_mode<synchronous>, transform_indices = @transform_2, window_bounds = array<i64: 16, 1>}, {pipeline_mode = #tpu.pipeline_mode<synchronous>, transform_indices = @transform_3, window_bounds = array<i64: 16, 16>}, {pipeline_mode = #tpu.pipeline_mode<synchronous>, transform_indices = @transform_4, window_bounds = array<i64: 16, 1>}, {pipeline_mode = #tpu.pipeline_mode<synchronous>, transform_indices = @transform_5, window_bounds = array<i64: 16, 16>}, {pipeline_mode = #tpu.pipeline_mode<synchronous>, transform_indices = @transform_6, window_bounds = array<i64: 16, 1>}, {pipeline_mode = #tpu.pipeline_mode<synchronous>, transform_indices = @transform_7, window_bounds = array<i64: 2, 16>}, {pipeline_mode = #tpu.pipeline_mode<synchronous>, transform_indices = @transform_8, window_bounds = array<i64: 2, 1>}, {transform_indices = @transform_9, window_bounds = array<i64: 2, 8>}]} {
    %c0 = arith.constant 0 : index
    %c0_0 = arith.constant 0 : index
    %0 = vector.load %arg2[%c0, %c0_0] : memref<32x8xf32, #tpu.memory_space<vmem>>, vector<32x8xf32>
    %c0_1 = arith.constant 0 : index
    %c0_2 = arith.constant 0 : index
    %1 = vector.load %arg3[%c0_1, %c0_2] : memref<16x32xf32, #tpu.memory_space<vmem>>, vector<16x32xf32>
    %cst = arith.constant dense<0.000000e+00> : vector<16x8xf32>
    %2 = tpu.matmul %1, %0, %cst {dimension_numbers = #tpu.dot_dimension_numbers<[1], [0], [0], [1], [0, 0, 1, 1], [], []>} : vector<16x32xf32>, vector<32x8xf32>, vector<16x8xf32> -> vector<16x8xf32>
    %c0_3 = arith.constant 0 : index
    %c0_4 = arith.constant 0 : index
    %3 = vector.load %arg4[%c0_3, %c0_4] : memref<16x1xf32, #tpu.memory_space<vmem>>, vector<16x1xf32>
    %4 = vector.broadcast %3 : vector<16x1xf32> to vector<16x8xf32>
    %5 = arith.addf %2, %4 : vector<16x8xf32>
    %cst_5 = arith.constant 0.000000e+00 : f32
    %6 = vector.broadcast %cst_5 : f32 to vector<16x8xf32>
    %7 = arith.maximumf %5, %6 : vector<16x8xf32>
    %c0_6 = arith.constant 0 : index
    %c0_7 = arith.constant 0 : index
    %8 = vector.load %arg5[%c0_6, %c0_7] : memref<16x16xf32, #tpu.memory_space<vmem>>, vector<16x16xf32>
    %cst_8 = arith.constant dense<0.000000e+00> : vector<16x8xf32>
    %9 = tpu.matmul %8, %7, %cst_8 {dimension_numbers = #tpu.dot_dimension_numbers<[1], [0], [0], [1], [0, 0, 1, 1], [], []>} : vector<16x16xf32>, vector<16x8xf32>, vector<16x8xf32> -> vector<16x8xf32>
    %c0_9 = arith.constant 0 : index
    %c0_10 = arith.constant 0 : index
    %10 = vector.load %arg6[%c0_9, %c0_10] : memref<16x1xf32, #tpu.memory_space<vmem>>, vector<16x1xf32>
    %11 = vector.broadcast %10 : vector<16x1xf32> to vector<16x8xf32>
    %12 = arith.addf %9, %11 : vector<16x8xf32>
    %cst_11 = arith.constant 0.000000e+00 : f32
    %13 = vector.broadcast %cst_11 : f32 to vector<16x8xf32>
    %14 = arith.maximumf %12, %13 : vector<16x8xf32>
    %c0_12 = arith.constant 0 : index
    %c0_13 = arith.constant 0 : index
    %15 = vector.load %arg7[%c0_12, %c0_13] : memref<16x16xf32, #tpu.memory_space<vmem>>, vector<16x16xf32>
    %cst_14 = arith.constant dense<0.000000e+00> : vector<16x8xf32>
    %16 = tpu.matmul %15, %14, %cst_14 {dimension_numbers = #tpu.dot_dimension_numbers<[1], [0], [0], [1], [0, 0, 1, 1], [], []>} : vector<16x16xf32>, vector<16x8xf32>, vector<16x8xf32> -> vector<16x8xf32>
    %c0_15 = arith.constant 0 : index
    %c0_16 = arith.constant 0 : index
    %17 = vector.load %arg8[%c0_15, %c0_16] : memref<16x1xf32, #tpu.memory_space<vmem>>, vector<16x1xf32>
    %18 = vector.broadcast %17 : vector<16x1xf32> to vector<16x8xf32>
    %19 = arith.addf %16, %18 : vector<16x8xf32>
    %cst_17 = arith.constant 0.000000e+00 : f32
    %20 = vector.broadcast %cst_17 : f32 to vector<16x8xf32>
    %21 = arith.maximumf %19, %20 : vector<16x8xf32>
    %c0_18 = arith.constant 0 : index
    %c0_19 = arith.constant 0 : index
    %22 = vector.load %arg9[%c0_18, %c0_19] : memref<2x16xf32, #tpu.memory_space<vmem>>, vector<2x16xf32>
    %cst_20 = arith.constant dense<0.000000e+00> : vector<2x8xf32>
    %23 = tpu.matmul %22, %21, %cst_20 {dimension_numbers = #tpu.dot_dimension_numbers<[1], [0], [0], [1], [0, 0, 1, 1], [], []>} : vector<2x16xf32>, vector<16x8xf32>, vector<2x8xf32> -> vector<2x8xf32>
    %c0_21 = arith.constant 0 : index
    %c0_22 = arith.constant 0 : index
    %24 = vector.load %arg10[%c0_21, %c0_22] : memref<2x1xf32, #tpu.memory_space<vmem>>, vector<2x1xf32>
    %25 = vector.broadcast %24 : vector<2x1xf32> to vector<2x8xf32>
    %26 = arith.addf %23, %25 : vector<2x8xf32>
    %c0_23 = arith.constant 0 : index
    %c0_24 = arith.constant 0 : index
    %27 = vector.load %arg11[%c0_23, %c0_24] : memref<2x8xf32, #tpu.memory_space<vmem>>, vector<2x8xf32>
    tpu.vector_store %arg11[%c0_23, %c0_24], %26 {strides = array<i32>} : memref<2x8xf32, #tpu.memory_space<vmem>>, vector<2x8xf32>,
    return
  }
  func.func @transform_0(%arg0: i32, %arg1: memref<1xi32, #tpu.memory_space<smem>>) -> (i32, i32) {
    %c0_i32 = arith.constant 0 : i32
    %c0_i32_0 = arith.constant 0 : i32
    return %c0_i32, %arg0 : i32, i32
  }
  func.func @transform_1(%arg0: i32, %arg1: memref<1xi32, #tpu.memory_space<smem>>) -> (i32, i32) {
    %c0_i32 = arith.constant 0 : i32
    %c0_i32_0 = arith.constant 0 : i32
    %c0_i32_1 = arith.constant 0 : i32
    return %c0_i32, %c0_i32_0 : i32, i32
  }
  func.func @transform_2(%arg0: i32, %arg1: memref<1xi32, #tpu.memory_space<smem>>) -> (i32, i32) {
    %c0_i32 = arith.constant 0 : i32
    %c0_i32_0 = arith.constant 0 : i32
    %c0_i32_1 = arith.constant 0 : i32
    return %c0_i32, %c0_i32_0 : i32, i32
  }
  func.func @transform_3(%arg0: i32, %arg1: memref<1xi32, #tpu.memory_space<smem>>) -> (i32, i32) {
    %c0_i32 = arith.constant 0 : i32
    %c0_i32_0 = arith.constant 0 : i32
    %c0_i32_1 = arith.constant 0 : i32
    return %c0_i32, %c0_i32_0 : i32, i32
  }
  func.func @transform_4(%arg0: i32, %arg1: memref<1xi32, #tpu.memory_space<smem>>) -> (i32, i32) {
    %c0_i32 = arith.constant 0 : i32
    %c0_i32_0 = arith.constant 0 : i32
    %c0_i32_1 = arith.constant 0 : i32
    return %c0_i32, %c0_i32_0 : i32, i32
  }
  func.func @transform_5(%arg0: i32, %arg1: memref<1xi32, #tpu.memory_space<smem>>) -> (i32, i32) {
    %c0_i32 = arith.constant 0 : i32
    %c0_i32_0 = arith.constant 0 : i32
    %c0_i32_1 = arith.constant 0 : i32
    return %c0_i32, %c0_i32_0 : i32, i32
  }
  func.func @transform_6(%arg0: i32, %arg1: memref<1xi32, #tpu.memory_space<smem>>) -> (i32, i32) {
    %c0_i32 = arith.constant 0 : i32
    %c0_i32_0 = arith.constant 0 : i32
    %c0_i32_1 = arith.constant 0 : i32
    return %c0_i32, %c0_i32_0 : i32, i32
  }
  func.func @transform_7(%arg0: i32, %arg1: memref<1xi32, #tpu.memory_space<smem>>) -> (i32, i32) {
    %c0_i32 = arith.constant 0 : i32
    %c0_i32_0 = arith.constant 0 : i32
    %c0_i32_1 = arith.constant 0 : i32
    return %c0_i32, %c0_i32_0 : i32, i32
  }
  func.func @transform_8(%arg0: i32, %arg1: memref<1xi32, #tpu.memory_space<smem>>) -> (i32, i32) {
    %c0_i32 = arith.constant 0 : i32
    %c0_i32_0 = arith.constant 0 : i32
    %c0_i32_1 = arith.constant 0 : i32
    return %c0_i32, %c0_i32_0 : i32, i32
  }
  func.func @transform_9(%arg0: i32, %arg1: memref<1xi32, #tpu.memory_space<smem>>) -> (i32, i32) {
    %c0_i32 = arith.constant 0 : i32
    %c0_i32_0 = arith.constant 0 : i32
    return %c0_i32, %arg0 : i32, i32
  }
}

</mosaic_0001>

<bundles_post_ra>
// kernel: tpu_custom_call.1
= control target key start
LH: loop header
LB: loop body
LE: loop exit
PB: predicated region body
PF: predicated region fallthrough
CT: control target
= control target key end

     0   :  { %vm53_vm0 = vcmask 261120   ;;  %v534_v6 = vmov 0   ;;  %s667_s0 = inlined_call_operand.<no memory space> [shape: s32[1], index: 0, kind: input, shape index: {}]   ;;  %s668_s1 = inlined_call_operand.vmem [shape: f32[32,8], index: 1, kind: input, shape index: {}]   ;;  %s669_s2 = inlined_call_operand.vmem [shape: f32[16,32], index: 2, kind: input, shape index: {}]   ;;  %s670_s3 = inlined_call_operand.vmem [shape: f32[16,1], index: 3, kind: input, shape index: {}]   ;;  %s671_s4 = inlined_call_operand.vmem [shape: f32[16,16], index: 4, kind: input, shape index: {}]   ;;  %s672_s5 = inlined_call_operand.vmem [shape: f32[16,1], index: 5, kind: input, shape index: {}]   ;;  %s673_s6 = inlined_call_operand.vmem [shape: f32[16,16], index: 6, kind: input, shape index: {}]   ;;  %s674_s7 = inlined_call_operand.vmem [shape: f32[16,1], index: 7, kind: input, shape index: {}]   ;;  %s675_s8 = inlined_call_operand.vmem [shape: f32[2,16], index: 8, kind: input, shape index: {}]   ;;  %s676_s9 = inlined_call_operand.vmem [shape: f32[2,1], index: 9, kind: input, shape index: {}]   ;;  %s677_s10 = inlined_call_operand.hbm [shape: f32[2,8], index: 10, kind: output, shape index: {}]  }
   0x1   :  { %v35_v0 = vld [vmem:[%s668_s1] sm:$0xff]  ;;  %v36_v1 = vld [vmem:[%s668_s1 + $0x8] sm:$0xff]  ;;  %v37_v2 = vld [vmem:[%s668_s1 + $0x10] sm:$0xff]  ;;  %508 = vset.pattern.permute.xlu0 %v534_v6  ;;  %509 = vset.pattern.permute.xlu1 %v534_v6 }
   0x2   :  { %v484_v3 = vpack.c.bf16 %v36_v1, %v35_v0  ;;  %v38_v4 = vld [vmem:[%s668_s1 + $0x18] sm:$0xff]  ;;  %v39_v5 = vld [vmem:[%s669_s2] sm:$0xff] }
   0x3   :  { %v488_v7 = vpack.c.bf16 %v38_v4, %v37_v2  ;;  %460 = vmatprep.mubr.msk.f32.mxu0 %vm53_vm0, %v39_v5  ;;  %v41_v8 = vld [vmem:[%s670_s3] sm:$0xff] }
   0x4   :  { %485 = vmatprep.subr.bf16.mxu0 %v484_v3  ;;  %45 = vperm.xlu0 %508, %v41_v8  }
   0x5   :  { %16 = vsyncpa [#allocation5], 0  ;;  %487 = vmatpush3.bf16.msra.mxu0 %v484_v3  ;;  %v42_v9 = vld [vmem:[%s670_s3 + $0x8] sm:$0xff]  ;;  %v237_v11 = vld [vmem:[%s674_s7] sm:$0xff]  ;;  %vm151_vm1 = vcmask 130048   ;;  %v535_v38 = vmov 0.0|0.0  }
   0x6   :  { %489 = vmatprep.subr.bf16.mxu0 %v488_v7  ;;  %v40_v10 = vld [vmem:[%s669_s2 + $0x8] sm:$0xff]  ;;  %v333_v12 = vld [vmem:[%s676_s9] sm:$0x3]  ;;  %vm536_vm2 = vmmov 0   ;;  %v537_v39 = vmov 0.0   ;;  %vm412_vm3 = vcmask 58368  }
   0x7   :  { %v137_v13 = vld [vmem:[%s671_s4] sm:$0xff]  ;;  %v140_v15 = vld [vmem:[%s672_s5 + $0x8] sm:$0xff] }
   0x8   :  { %50 = vperm.xlu0 %508, %v42_v9   ;;  %467 = vmatprep.mubr.msk.f32.mxu1 %vm151_vm1, %v137_v13  ;;  %v139_v14 = vld [vmem:[%s672_s5] sm:$0xff]  ;;  %v238_v16 = vld [vmem:[%s674_s7 + $0x8] sm:$0xff] }
   0x9   :  { %491 = vmatpush3.bf16.msra.mxu0 %v488_v7  ;;  %143 = vperm.xlu1 %509, %v139_v14   ;;  %v138_v26 = vld [vmem:[%s671_s4 + $0x8] sm:$0xff]  ;;  %v235_v27 = vld [vmem:[%s673_s6] sm:$0xff] }
   0xa   :  { %v236_v37 = vld [vmem:[%s673_s6 + $0x8] sm:$0xff]  ;;  %500 = vmatprep.subr.bf16.mxu0 %v535_v38  ;;  %v332_v49 = vld [vmem:[%s675_s8] sm:$0x3]  ;;  %s538_s6 = smov [#allocation4]  }
   0xb   :  { %s420_s20 = sshll.u32 %s538_s6, 4  ;;  %s421_s20 = int_to_ptr.vmem [resolvable:$true] %s420_s20 }
   0xc   :  { %461 = vmatmul.mubr.msk.f32.vlgmr.msra.gmra.mrb[0].mxu0 %vm53_vm0, %v40_v10  ;;  %241 = vperm.xlu0 %508, %v237_v11   ;;  %s510_s21 = scalar_lea.vmem %s421_s20, 32  ;;  %p515_p1 = scmp.lt.s32.totalorder %s421_s20, %s421_s20 }
   0xd   :  { %148 = vperm.xlu1 %509, %v140_v15   ;;  %481 = vmatprep.mubr.msk.f32.mxu0 %vm536_vm2, %v537_v39  ;;  %p511_p0 = scmp.ne.s32.totalorder %s421_s20, %s510_s21  ;;  %p516_p2 = scmp.lt.s32.totalorder %s510_s21, %s510_s21 }
   0xf   :  { %p517_p3 = por %p516_p2, %p515_p1 }
  0x10   :  { %336 = vperm.xlu0 %508, %v333_v12  }
  0x11   :  { %246 = vperm.xlu1 %509, %v238_v16   ;;  %p518_p4 = pnand %p517_p3, %p511_p0 }
  0x83   :  { %v46_v17 = vpop.permute.xlu0 %45 }
  0x87   :  { %v51_v18 = vpop.permute.xlu0 %50 }
  0x88   :  { %v144_v28 = vpop.permute.xlu1 %143 }
  0x8b   :  { %v242_v42 = vpop.permute.xlu0 %241 }
  0x8c   :  { %v149_v29 = vpop.permute.xlu1 %148 }
  0x8f   :  { %v337_v50 = vpop.permute.xlu0 %336 }
  0x90   :  { %v247_v40 = vpop.permute.xlu1 %246 }
  0xdf   :  { %v462_v19 = vpop.f32.mrb[0].mxu0 }
  0xe0   :  { %v132_v20 = vadd.f32 %v462_v19, %v51_v18  ;;  %v126_v21 = vpop.f32.mrb[1].mxu0 }
  0xe1   :  { %v127_v22 = vadd.f32 %v126_v21, %v46_v17 }
  0xe2   :  { %v136_v23 = vmax.f32 %v132_v20, 0.0 }
  0xe3   :  { %v135_v24 = vmax.f32 %v127_v22, 0.0 }
  0xe5   :  { %v492_v25 = vpack.c.bf16 %v136_v23, %v135_v24 }
  0xe7   :  { %493 = vmatprep.subr.bf16.mxu1 %v492_v25 }
  0xe8   :  { %495 = vmatpush3.bf16.msra.mxu1 %v492_v25 }
  0xeb   :  { %468 = vmatmul.mubr.msk.f32.vlgmr.msra.gmra.mrb[0].mxu1 %vm151_vm1, %v138_v26 }
  0xec   :  { %474 = vmatprep.mubr.msk.f32.mxu1 %vm151_vm1, %v235_v27 }
 0x1be   :  { %v469_v30 = vpop.f32.mrb[0].mxu1 }
 0x1bf   :  { %v230_v31 = vadd.f32 %v469_v30, %v149_v29  ;;  %v224_v32 = vpop.f32.mrb[1].mxu1 }
 0x1c0   :  { %v225_v33 = vadd.f32 %v224_v32, %v144_v28 }
 0x1c1   :  { %v234_v34 = vmax.f32 %v230_v31, 0.0 }
 0x1c2   :  { %v233_v35 = vmax.f32 %v225_v33, 0.0 }
 0x1c4   :  { %v496_v36 = vpack.c.bf16 %v234_v34, %v233_v35 }
 0x1c6   :  { %497 = vmatprep.subr.bf16.mxu1 %v496_v36 }
 0x1c7   :  { %499 = vmatpush3.bf16.msra.mxu1 %v496_v36 }
 0x1ca   :  { %475 = vmatmul.mubr.msk.f32.vlgmr.msra.gmra.mrb[2].mxu1 %vm151_vm1, %v236_v37 }
 0x29d   :  { %v476_v41 = vpop.f32.mrb[2].mxu1 }
 0x29e   :  { %v327_v43 = vadd.f32 %v476_v41, %v247_v40  ;;  %v321_v44 = vpop.f32.mrb[3].mxu1 }
 0x29f   :  { %v322_v45 = vadd.f32 %v321_v44, %v242_v42 }
 0x2a0   :  { %v331_v46 = vmax.f32 %v327_v43, 0.0 }
 0x2a1   :  { %v330_v47 = vmax.f32 %v322_v45, 0.0 }
 0x2a3   :  { %v501_v48 = vpack.c.bf16 %v331_v46, %v330_v47 }
 0x2a5   :  { %502 = vmatpush3.bf16.msra.mxu0 %v501_v48 }
 0x2a8   :  { %482 = vmatmul.mubr.msk.f32.vlgmr.msra.gmra.mrb[2].mxu0 %vm151_vm1, %v332_v49 }
 0x37b   :  { %v408_v51 = vpop.f32.mrb[2].mxu0 }
 0x37c   :  { %v409_v52 = vadd.f32 %v408_v51, %v337_v50  ;;  %v483_v53 = vpop.f32.mrb[3].mxu0 }
 0x37e   :  { %413 = vst.msk [vmem:[#allocation4] sm:$0x3] %vm412_vm3, %v409_v52 }
 0x37f   :  { %521 = shalt.err (!%p518_p4)
}
 0x380   :  { %s522_s23 = scalar_lea.hbm %s677_s10, 32 }
 0x381   :  { %p523_p5 = scmp.ne.s32.totalorder %s677_s10, %s522_s23  ;;  %p526_p6 = scmp.lt.u32.totalorder %s522_s23, %s677_s10 }
 0x383   :  { %p528_p7 = pnand %p526_p6, %p523_p5 }
 0x385   :  { %531 = shalt.err (!%p528_p7)
}
 0x386   :  { %423 = dma.vmem_to_hbm [thread:$0]  %s421_s20, 32, %s677_s10, [#allocation5]  }
 0x387   :  { %532 = dma.done.wait [#allocation5], 32  }
 0x388   :  { %533 = vsyncadd [#allocation5], 4294967264 }
 0x389   :  { %427 = vsyncpa [#allocation5], 1 }

</bundles_post_ra>
